<compile_context>
chip_gen: v7x
topology: tpu7x:2x2x1
jax: 0.10.0
libtpu: 0.0.40
codegen_flags: <defaults>
</compile_context>

<pallas_src>
import math

import jax
import jax.numpy as jnp
from jax import lax
from jax.experimental import pallas as pl
from jax.experimental.pallas import tpu as pltpu

EPS = 1e-5
_LANES = 128
_SUBLANE_BASE = 8            # fp32 sublane tile; scaled by 4/itemsize for narrow dtypes
_MAX_TILE_ROWS = 8192
_MAX_PACKED_CP = 512         # cap on packed lane width (bounds the (Cp,Cp) A matrix)


def _vmem_caps():
    """(tile-budget bytes, vmem_limit_bytes). Conservative default is v7x-safe."""
    try:
        cap = int(pltpu.get_tpu_info().vmem_capacity_bytes)
    except Exception:
        cap = 0
    if cap >= 96 * 1024 * 1024:          # v5e / v6e: 128 MiB physical VMEM
        return 40 * 1024 * 1024, 64 * 1024 * 1024
    return 20 * 1024 * 1024, 32 * 1024 * 1024   # v7x: 64 MiB physical VMEM


def _pick_packing(C):
    """Fold k consecutive rows into one lane-row so k*C is a multiple of 128."""
    if C >= _LANES:
        return 1
    k = _LANES // math.gcd(C, _LANES)    # minimal k with (k*C) % 128 == 0
    if k * C > _MAX_PACKED_CP:
        return 1                         # packing would blow up the A matrix
    return k


def _choose_tile_rows(Rp, Cp, itemsize, sub, budget):
    """Largest row tile fitting the VMEM budget, incl. fp32 temporaries."""
    # 2x double-buffered (input + output) tiles at input dtype + ~4 fp32 temps.
    per_row = 2 * 2 * Cp * itemsize + 4 * Cp * 4
    tm = budget // max(per_row, 1)
    tm = int(min(tm, _MAX_TILE_ROWS, Rp))
    # Keep >= 4 grid blocks when the problem is big enough, so v7x's two
    # TensorCores both get work and the pipeline has blocks to overlap.
    if Rp >= 4 * sub:
        tm = min(tm, pl.cdiv(Rp, 4))
    if tm < Rp:
        tm = max(sub, (tm // sub) * sub)
    return max(1, tm)


def _make_ln_kernel(C, k, has_bias):
    """Kernel over a (tm, k*C) lane-dense tile: k packed rows per lane-row."""
    inv_c = float(1.0 / C)

    def kernel(*refs):
        refs = list(refs)
        x_ref = refs.pop(0)
        w_ref = refs.pop(0)
        a_ref = refs.pop(0) if k > 1 else None
        b_ref = refs.pop(0) if has_bias else None
        o_ref = refs.pop(0)

        x = x_ref[...].astype(jnp.float32)          # (tm, Cp)
        w = w_ref[...].astype(jnp.float32)          # (1, Cp)

        if k == 1:
            # Plain last-dim layernorm: two-pass (mean, then centered moment).
            mean = jnp.sum(x, axis=-1, keepdims=True) * inv_c
            xc = x - mean
            var = jnp.sum(xc * xc, axis=-1, keepdims=True) * inv_c
        else:
            # Segmented (per packed group of C lanes) stats via the MXU:
            # A is block-diagonal with 1/C, so x @ A broadcasts each group's
            # mean across that group's lanes.  MXU is otherwise idle here.
            A = a_ref[...]                          # (Cp, Cp) f32
            mean = jnp.dot(x, A, preferred_element_type=jnp.float32)
            xc = x - mean
            var = jnp.dot(xc * xc, A, preferred_element_type=jnp.float32)

        inv = lax.rsqrt(var + EPS)
        y = (xc if has_bias else x) * inv * w
        if has_bias:
            y = y + b_ref[...].astype(jnp.float32)
        o_ref[...] = y.astype(o_ref.dtype)

    return kernel


def layernorm_without_shape(x, weight, bias=None, *, tile_rows=None):
    """x: (..., C); weight/bias: (C,).  bias=None -> BiasFree, else WithBias."""
    orig_shape = x.shape
    C = orig_shape[-1]
    assert weight.shape == (C,)
    dtype = x.dtype
    itemsize = jnp.dtype(dtype).itemsize
    R = math.prod(orig_shape[:-1]) if len(orig_shape) > 1 else 1
    x2 = x.reshape(R, C)

    # Lane-dense repack: k consecutive rows per 128-lane-aligned lane-row.
    k = _pick_packing(C)
    R_pad = R
    if k > 1 and R % k:
        # Pad rows so the contiguous (Rp, Cp) reshape exists; padded rows are
        # computed (finite garbage) and sliced off below.
        R_pad = R + (k - R % k)
        x2 = jnp.pad(x2, ((0, R_pad - R), (0, 0)))
    Cp = C * k
    Rp = R_pad // k
    x2 = x2.reshape(Rp, Cp)

    w2 = weight.reshape(1, C)
    if k > 1:
        w2 = jnp.tile(w2, (1, k))
    args = [x2, w2]
    in_specs = [None, pl.BlockSpec((1, Cp), lambda i: (0, 0))]

    if k > 1:
        gid = jnp.arange(Cp, dtype=jnp.int32) // C
        A = jnp.where(gid[:, None] == gid[None, :],
                      jnp.float32(1.0 / C), jnp.float32(0.0))
        args.append(A)
        in_specs.append(pl.BlockSpec((Cp, Cp), lambda i: (0, 0)))

    if bias is not None:
        assert bias.shape == (C,)
        b2 = bias.reshape(1, C)
        if k > 1:
            b2 = jnp.tile(b2, (1, k))
        args.append(b2)
        in_specs.append(pl.BlockSpec((1, Cp), lambda i: (0, 0)))

    sub = _SUBLANE_BASE * max(1, 4 // itemsize)     # 8 / 16 / 32 by dtype width
    budget, vmem_limit = _vmem_caps()
    if tile_rows is None:
        tm = _choose_tile_rows(Rp, Cp, itemsize, sub, budget)
    else:
        tm = min(int(tile_rows), Rp)
        if tm < Rp:
            tm = max(sub, (tm // sub) * sub)

    in_specs[0] = pl.BlockSpec((tm, Cp), lambda i: (i, 0))

    out = pl.pallas_call(
        _make_ln_kernel(C, k, bias is not None),
        out_shape=jax.ShapeDtypeStruct((Rp, Cp), dtype),
        grid=(pl.cdiv(Rp, tm),),                    # ragged tail handled by Pallas
        in_specs=in_specs,
        out_specs=pl.BlockSpec((tm, Cp), lambda i: (i, 0)),
        compiler_params=pltpu.CompilerParams(
            dimension_semantics=("parallel",),      # shard row grid across TCs (v7x)
            vmem_limit_bytes=vmem_limit,
        ),
    )(*args)

    out = out.reshape(R_pad, C)
    if R_pad != R:
        out = out[:R]
    return out.reshape(orig_shape)


def biasfree_layernorm(x, weight, **kw):
    return layernorm_without_shape(x, weight, None, **kw)


def withbias_layernorm(x, weight, bias, **kw):
    return layernorm_without_shape(x, weight, bias, **kw)


def reference(x, weight, bias=None):
    x32 = x.astype(jnp.float32)
    var = jnp.var(x32, axis=-1, keepdims=True)       # ddof=0 == unbiased=False
    if bias is None:
        y = x32 / jnp.sqrt(var + EPS) * weight.astype(jnp.float32)
    else:
        mu = jnp.mean(x32, axis=-1, keepdims=True)
        y = (x32 - mu) / jnp.sqrt(var + EPS) * weight.astype(jnp.float32) \
            + bias.astype(jnp.float32)
    return y.astype(x.dtype)


if __name__ == "__main__":
    key = jax.random.PRNGKey(0)
    kx, kw, kb, kx2, kx3 = jax.random.split(key, 5)

    # 1) LayerNorm_Without_Shape(dim=32, 'BiasFree'): tokens (B, N, C), packed k=4.
    B, N, C = 2, 64, 32
    x = jax.random.normal(kx, (B, N, C), dtype=jnp.float32) + 3.0   # offset mean
    weight = jnp.ones((C,), dtype=jnp.float32)
    out_bf = jax.block_until_ready(biasfree_layernorm(x, weight))
    ref_bf = reference(x, weight)
    assert out_bf.shape == x.shape and out_bf.dtype == x.dtype
    assert jnp.allclose(out_bf, ref_bf, atol=2e-5, rtol=2e-5), \
        float(jnp.max(jnp.abs(out_bf - ref_bf)))

    # 2) 'WithBias', rows not divisible by k (R=150, k=4 -> padded), small tile
    #    forces a multi-step grid with a ragged last block.
    B2, N2 = 3, 50
    x_wb = jax.random.normal(kx2, (B2, N2, C), dtype=jnp.float32)
    w_wb = 1.0 + 0.1 * jax.random.normal(kw, (C,), dtype=jnp.float32)
    b_wb = 0.1 * jax.random.normal(kb, (C,), dtype=jnp.float32)
    out_wb = jax.block_until_ready(withbias_layernorm(x_wb, w_wb, b_wb, tile_rows=16))
    ref_wb = reference(x_wb, w_wb, b_wb)
    assert jnp.allclose(out_wb, ref_wb, atol=2e-5, rtol=2e-5), \
        float(jnp.max(jnp.abs(out_wb - ref_wb)))

    # 3) k == 1 path (C >= 128): BiasFree with C = 256.
    x3 = jax.random.normal(kx, (2, 16, 256), dtype=jnp.float32) - 2.0
    w3 = jnp.ones((256,), dtype=jnp.float32)
    out3 = jax.block_until_ready(biasfree_layernorm(x3, w3))
    ref3 = reference(x3, w3)
    assert jnp.allclose(out3, ref3, atol=2e-5, rtol=2e-5), \
        float(jnp.max(jnp.abs(out3 - ref3)))

    # 4) Generalized packing where 128 % C != 0: C=48 -> k=8, Cp=384.
    x4 = jax.random.normal(kx3, (2, 24, 48), dtype=jnp.float32)
    w4 = 1.0 + 0.05 * jax.random.normal(kw, (48,), dtype=jnp.float32)
    b4 = 0.05 * jax.random.normal(kb, (48,), dtype=jnp.float32)
    out4 = jax.block_until_ready(withbias_layernorm(x4, w4, b4))
    ref4 = reference(x4, w4, b4)
    assert jnp.allclose(out4, ref4, atol=2e-5, rtol=2e-5), \
        float(jnp.max(jnp.abs(out4 - ref4)))

    # 5) bf16 path (dtype-aware sublane tile = 16): C=64 -> k=2.
    x5 = jax.random.normal(kx2, (2, 64, 64), dtype=jnp.float32).astype(jnp.bfloat16)
    w5 = jnp.ones((64,), dtype=jnp.float32)
    out5 = jax.block_until_ready(biasfree_layernorm(x5, w5))
    ref5 = reference(x5, w5)
    assert out5.dtype == jnp.bfloat16
    assert jnp.allclose(out5.astype(jnp.float32), ref5.astype(jnp.float32),
                        atol=5e-2, rtol=5e-2), \
        float(jnp.max(jnp.abs(out5.astype(jnp.float32) - ref5.astype(jnp.float32))))

    print("KERNEL_OK")
</pallas_src>

<mosaic_0001>
module attributes {stable_mosaic.version = 11 : i64} {
  func.func @kernel(%arg0: i32, %arg1: memref<8x128xf32, #tpu.memory_space<vmem>>, %arg2: memref<1x128xf32, #tpu.memory_space<vmem>>, %arg3: memref<128x128xf32, #tpu.memory_space<vmem>>, %arg4: memref<8x128xf32, #tpu.memory_space<vmem>>) attributes {dimension_semantics = [#tpu.dimension_semantics<parallel>], iteration_bounds = array<i64: 4>, scalar_prefetch = 0 : i64, scratch_operands = 0 : i64, tpu.core_type = #tpu.core_type<tc>, window_params = [{transform_indices = @transform_0, window_bounds = array<i64: 8, 128>}, {pipeline_mode = #tpu.pipeline_mode<synchronous>, transform_indices = @transform_1, window_bounds = array<i64: 1, 128>}, {pipeline_mode = #tpu.pipeline_mode<synchronous>, transform_indices = @transform_2, window_bounds = array<i64: 128, 128>}, {transform_indices = @transform_3, window_bounds = array<i64: 8, 128>}]} {
    %c0 = arith.constant 0 : index
    %c0_0 = arith.constant 0 : index
    %0 = vector.load %arg1[%c0, %c0_0] : memref<8x128xf32, #tpu.memory_space<vmem>>, vector<8x128xf32>
    %c0_1 = arith.constant 0 : index
    %c0_2 = arith.constant 0 : index
    %1 = vector.load %arg2[%c0_1, %c0_2] : memref<1x128xf32, #tpu.memory_space<vmem>>, vector<1x128xf32>
    %c0_3 = arith.constant 0 : index
    %c0_4 = arith.constant 0 : index
    %2 = vector.load %arg3[%c0_3, %c0_4] : memref<128x128xf32, #tpu.memory_space<vmem>>, vector<128x128xf32>
    %cst = arith.constant dense<0.000000e+00> : vector<8x128xf32>
    %3 = tpu.matmul %0, %2, %cst {dimension_numbers = #tpu.dot_dimension_numbers<[1], [0], [0], [1], [0, 0, 1, 1], [], []>} : vector<8x128xf32>, vector<128x128xf32>, vector<8x128xf32> -> vector<8x128xf32>
    %4 = arith.subf %0, %3 : vector<8x128xf32>
    %5 = arith.mulf %4, %4 : vector<8x128xf32>
    %cst_5 = arith.constant dense<0.000000e+00> : vector<8x128xf32>
    %6 = tpu.matmul %5, %2, %cst_5 {dimension_numbers = #tpu.dot_dimension_numbers<[1], [0], [0], [1], [0, 0, 1, 1], [], []>} : vector<8x128xf32>, vector<128x128xf32>, vector<8x128xf32> -> vector<8x128xf32>
    %cst_6 = arith.constant 9.99999974E-6 : f32
    %7 = vector.broadcast %cst_6 : f32 to vector<8x128xf32>
    %8 = arith.addf %6, %7 : vector<8x128xf32>
    %9 = math.rsqrt %8 : vector<8x128xf32>
    %10 = arith.mulf %0, %9 : vector<8x128xf32>
    %11 = vector.broadcast %1 : vector<1x128xf32> to vector<8x128xf32>
    %12 = arith.mulf %10, %11 : vector<8x128xf32>
    %c0_7 = arith.constant 0 : index
    %c0_8 = arith.constant 0 : index
    %13 = vector.load %arg4[%c0_7, %c0_8] : memref<8x128xf32, #tpu.memory_space<vmem>>, vector<8x128xf32>
    tpu.vector_store %arg4[%c0_7, %c0_8], %12 {strides = array<i32>} : memref<8x128xf32, #tpu.memory_space<vmem>>, vector<8x128xf32>,
    return
  }
  func.func @transform_0(%arg0: i32) -> (i32, i32) {
    %c0_i32 = arith.constant 0 : i32
    %c0_i32_0 = arith.constant 0 : i32
    return %arg0, %c0_i32 : i32, i32
  }
  func.func @transform_1(%arg0: i32) -> (i32, i32) {
    %c0_i32 = arith.constant 0 : i32
    %c0_i32_0 = arith.constant 0 : i32
    %c0_i32_1 = arith.constant 0 : i32
    return %c0_i32, %c0_i32_0 : i32, i32
  }
  func.func @transform_2(%arg0: i32) -> (i32, i32) {
    %c0_i32 = arith.constant 0 : i32
    %c0_i32_0 = arith.constant 0 : i32
    %c0_i32_1 = arith.constant 0 : i32
    return %c0_i32, %c0_i32_0 : i32, i32
  }
  func.func @transform_3(%arg0: i32) -> (i32, i32) {
    %c0_i32 = arith.constant 0 : i32
    %c0_i32_0 = arith.constant 0 : i32
    return %arg0, %c0_i32 : i32, i32
  }
}

</mosaic_0001>

<bundles_post_ra>
// kernel: tpu_custom_call.1
= control target key start
LH: loop header
LB: loop body
LE: loop exit
PB: predicated region body
PF: predicated region fallthrough
CT: control target
= control target key end

     0   :  { %8 = vsyncpa [#allocation3], 0  ;;  %s1051_s0 = inlined_call_operand.hbm [shape: f32[32,128], index: 0, kind: input, shape index: {}]   ;;  %s1052_s1 = inlined_call_operand.vmem [shape: f32[1,128], index: 1, kind: input, shape index: {}]   ;;  %s1053_s2 = inlined_call_operand.hbm [shape: f32[128,128], index: 2, kind: input, shape index: {}]   ;;  %s1054_s3 = inlined_call_operand.hbm [shape: f32[32,128], index: 3, kind: output, shape index: {}]  }
   0x1   :  { %10 = vsyncpa [#allocation3 + $0x1], 0 }
   0x2   :  { %11 = vsyncpa [#allocation6], 0 }
   0x3   :  { %12 = vsyncpa [#allocation4], 0 }
   0x4   :  { %14 = vsyncpa [#allocation4 + $0x1], 0  ;;  %s854_s12 = smov 0   ;;  %s856_s13 = smov 0  }
   0x5   :  { %s858_s14 = smov 0   ;;  %s860_s15 = smov 0  }
   0x6 LB: > { %s875_s16 = sadd.s32 4294967295, %s824_s15   ;;  %s465_s17 = sadd.s32 4294967294, %s824_s15   ;;  %s824_s15 = sphi %s860_s15, %s1073_s15   ;;  %s820_s14 = sphi %s858_s14, %s1072_s14   ;;  %s816_s13 = sphi %s856_s13, %s1071_s13   ;;  %s812_s12 = sphi %s854_s12, %s1070_s12  }
   0x7   : > { %p40_p0 = scmp.ne.s32.totalorder %s816_s13, %s812_s12  ;;  %p1055_p1 = scmp.eq.s32.totalorder %s875_s16, 0 }
   0x8   : > { %p112_p3 = scmp.eq.s32.totalorder %s465_s17, 3  ;;  %p466_p5 = scmp.ge.s32.totalorder %s824_s15, 1 }
   0x9   : > { %p884_p4 = por %p1055_p1, %p40_p0  ;;  %p119_p7 = scmp.lt.s32.totalorder %s824_s15, 5 }
   0xa   : > { %p889_p6 = por %p112_p3, %p40_p0  ;;  %s826_s21 = smov [#allocation5]  }
   0xb   : > { %s1058_s18 = scalar_select %p884_p4, 1, 0 }
   0xc   : > { %s1059_s19 = scalar_select %p889_p6, 1, 0 }
   0xd   : > { %p894_p8 = pnand %p466_p5, %p119_p7  ;;  %s134_s22 = sshll.u32 %s826_s21, 4  ;;  %s135_s22 = int_to_ptr.vmem [resolvable:$true] %s134_s22 }
   0xe   : > { %s907_s24 = sadd.s32 1, %s824_s15   ;;  %s27_s25 = sadd.s32 1, %s820_s14 }
   0xf   : > { %s1060_s20 = scalar_select %p894_p8, 1, 0 }
  0x10   : > { %p640_p9 = pneg %p894_p8  ;;  %s24_s26 = ssub.s32 %s824_s15, %s907_s24 }
  0x11   : > { %s696_s29 = scalar_lea.hbm %s1053_s2, 2048 }
  0x12   : > { %p902_p10 = pnand %p640_p9, %p1055_p1  ;;  %p697_p11 = scmp.ne.s32.totalorder %s1053_s2, %s696_s29 }
  0x13   : > { %p703_p3 = scmp.lt.u32.totalorder %s696_s29, %s1053_s2 }
  0x14   : > { %p698_p12 = pneg %p902_p10 }
  0x16   : > { %p699_p13 = pnand %p698_p12, %p697_p11 }
  0x18   : > { %p700_p0 = pneg %p699_p13 }
  0x1a   : > { %p705_p5 = pnand %p703_p3, %p700_p0 }
  0x1c   : > { %708 = shalt.err (!%p705_p5)
}
  0x1d   : > { %s709_s7 = scalar_lea.vmem %s135_s22, 2048  ;;  %p717_p2 = scmp.lt.s32.totalorder %s135_s22, %s135_s22 }
  0x1e   : > { %p710_p7 = scmp.ne.s32.totalorder %s135_s22, %s709_s7  ;;  %p718_p6 = scmp.lt.s32.totalorder %s709_s7, %s709_s7 }
  0x20   : > { %p712_p9 = pnand %p710_p7, %p698_p12  ;;  %p719_p4 = por %p718_p6, %p717_p2 }
  0x22   : > { %p713_p1 = pneg %p712_p9 }
  0x24   : > { %p720_p8 = pnand %p719_p4, %p713_p1 }
  0x26   : > { %723 = shalt.err (!%p720_p8)
}
  0x27   : > { %s827_s8 = smov 128   ;;  %s828_s9 = smov 8  }
  0x28   : > { %643 = dma.hbm_to_vmem [thread:$0]  (!%p902_p10), %s1053_s2, 2048, %s135_s22, [#allocation6], %s827_s8, %s827_s8, %s828_s9  }
  0x29   : > { %p25_p11 = scmp.eq.s32.totalorder %s24_s26, 0  ;;  %p34_p2 = scmp.ne.s32.totalorder %s820_s14, %s816_s13 }
  0x2a   : > { %p35_p1 = scmp.eq.s32.totalorder %s824_s15, 0  ;;  %p653_p4 = scmp.lt.s32.totalorder %s824_s15, 4 }
  0x2b   : > { %s933_s17 = scalar_select %p25_p11, %s820_s14, %s27_s25  }
  0x2c   : > { %p36_p6 = por %p35_p1, %p34_p2  ;;  %p1062_p8 = scmp.eq.s32.totalorder %s875_s16, 3 }
  0x2d   : > { %s148_s27 = sand.u32 1, %s820_s14   ;;  %s470_s28 = sshll.u32 %s824_s15, 7 }
  0x2e   : > { %p937_p12 = por %p1062_p8, %p34_p2  ;;  %s469_s29 = sshll.u32 %s148_s27, 3 }
  0x2f   : > { %s946_s4 = scalar_lea.hbm %s1051_s0, %s470_s28  ;;  %s152_s22 = scalar_lea.vmem [#allocation2], %s469_s29 }
  0x30   : > { %s159_s25 = sshll.u32 %s152_s22, 4  ;;  %p948_p10 = pnand %p653_p4, %p36_p6  ;;  %s952_s25 = int_to_ptr.vmem [resolvable:$true] %s159_s25 }
  0x31   : > { %s149_s5 = scalar_lea.sflag [#allocation3], %s148_s27  ;;  %s724_s6 = scalar_lea.hbm %s946_s4, 128 }
  0x32   : > { %p725_p13 = scmp.ne.s32.totalorder %s946_s4, %s724_s6  ;;  %p726_p0 = pneg %p948_p10 }
  0x33   : > { %s729_s9 = scalar_lea.hbm %s1051_s0, 512  ;;  %p730_p7 = scmp.lt.u32.totalorder %s946_s4, %s1051_s0 }
  0x34   : > { %p727_p3 = pnand %p726_p0, %p725_p13  ;;  %p731_p9 = scmp.lt.u32.totalorder %s729_s9, %s724_s6 }
  0x35   : > { %p733_p2 = scmp.lt.u32.totalorder %s724_s6, %s946_s4 }
  0x36   : > { %p728_p5 = pneg %p727_p3  ;;  %p732_p11 = por %p731_p9, %p730_p7 }
  0x38   : > { %p734_p1 = por %p733_p2, %p732_p11 }
  0x3a   : > { %p735_p4 = pnand %p734_p1, %p728_p5 }
  0x3c   : > { %738 = shalt.err (!%p735_p4)
}
  0x3d   : > { %s739_s27 = scalar_lea.vmem %s952_s25, 128  ;;  %s829_s28 = smov [#allocation2]  }
  0x3e   : > { %p740_p6 = scmp.ne.s32.totalorder %s952_s25, %s739_s27  ;;  %s744_s29 = sshll.u32 %s829_s28, 4  ;;  %s745_s29 = int_to_ptr.vmem [resolvable:$false] %s744_s29 }
  0x3f   : > { %s746_s23 = scalar_lea.vmem %s745_s29, 256  ;;  %p747_p3 = scmp.lt.s32.totalorder %s952_s25, %s745_s29 }
  0x40   : > { %p742_p8 = pnand %p740_p6, %p726_p0  ;;  %p748_p7 = scmp.lt.s32.totalorder %s746_s23, %s739_s27 }
  0x42   : > { %p743_p13 = pneg %p742_p8  ;;  %p749_p9 = por %p748_p7, %p747_p3 }
  0x44   : > { %p750_p11 = pnand %p749_p9, %p743_p13 }
  0x46   : > { %753 = shalt.err (!%p750_p11)
}
  0x47   : > { %647 = dma.hbm_to_vmem [thread:$0]  (!%p948_p10), %s946_s4, 128, %s952_s25, %s149_s5  }
  0x48   : > { %p1065_p5 = scmp.ne.s32.totalorder %s1060_s20, 0 }
  0x49   : > { %s982_s30 = sand.u32 (!%p1065_p5), 1, %s816_s13   ;;  %p1066_p0 = scmp.ne.s32.totalorder (!%p1065_p5), %s1058_s18, 0 }
  0x4a   : > { %168 = sbr.rel (%p1065_p5) target bundleno = 578 (0x242), region = 32  ;;  %s472_s22 = sshll.u32 (!%p1065_p5), %s982_s30, 3 }
  0x4b   : > { %s171_s6 = scalar_lea.sflag (!%p1065_p5), [#allocation3], %s982_s30  ;;  %s988_s7 = scalar_lea.vmem (!%p1065_p5), [#allocation2], %s472_s22 }
  0x51   : > { %799 = dma.done.wait (%p1066_p0), %s171_s6, 128  }
  0x52   : > { %801 = vsyncadd (%p1066_p0), %s171_s6, 4294967168  ;;  %p1067_p10 = scmp.eq.s32.totalorder %s875_s16, 0 }
  0x54   : > { %803 = dma.done.wait (%p1067_p10), [#allocation6], 2048   ;;  %p1068_p2 = pmov %p1067_p10 }
  0x55   : > { %v830_v0 = vmov 0.0|0.0   ;;  %vm831_vm0 = vmmov 0   ;;  %v832_v1 = vmov 0.0   ;;  %v203_v2 = vld [vmem:[#allocation5] sm:$0xff]  ;;  %v204_v3 = vld [vmem:[#allocation5 + $0x8] sm:$0xff]  ;;  %v205_v4 = vld [vmem:[#allocation5 + $0x10] sm:$0xff] }
  0x56   : > { %805 = vsyncadd (%p1068_p2), [#allocation6], 4294965248  ;;  %584 = vmatprep.subr.bf16.mxu0 %v830_v0  ;;  %546 = vmatprep.mubr.msk.f32.mxu0 %vm831_vm0, %v832_v1  ;;  %v585_v5 = vpack.c.bf16 %v204_v3, %v203_v2  ;;  %v206_v6 = vld [vmem:[#allocation5 + $0x18] sm:$0xff]  ;;  %v207_v8 = vld [vmem:[#allocation5 + $0x20] sm:$0xff]  ;;  %s477_s4 = sshll.u32 %s875_s16, 7  ;;  %s200_s25 = scalar_lea.vmem [#allocation7], %s472_s22 }
  0x57   : > { %608 = vmatprep.subr.bf16.mxu1 %v830_v0  ;;  %581 = vmatprep.mubr.msk.f32.mxu1 %vm831_vm0, %v832_v1  ;;  %v588_v7 = vpack.c.bf16 %v206_v6, %v205_v4  ;;  %v208_v9 = vld [vmem:[#allocation5 + $0x28] sm:$0xff]  ;;  %v209_v11 = vld [vmem:[#allocation5 + $0x30] sm:$0xff]  ;;  %v210_v12 = vld [vmem:[#allocation5 + $0x38] sm:$0xff]  ;;  %s385_s26 = sshll.u32 %s200_s25, 4  ;;  %s1008_s9 = scalar_lea.hbm %s1054_s3, %s477_s4  ;;  %s1010_s26 = int_to_ptr.vmem [resolvable:$true] %s385_s26 }
  0x58   : > { %586 = vmatpush3.bf16.msra.mxu0 %v585_v5  ;;  %610 = vmatpush3.bf16.msra.mxu1 %v585_v5  ;;  %v591_v10 = vpack.c.bf16 %v208_v9, %v207_v8  ;;  %v594_v13 = vpack.c.bf16 %v210_v12, %v209_v11  ;;  %v211_v14 = vld [vmem:[#allocation5 + $0x40] sm:$0xff]  ;;  %v212_v15 = vld [vmem:[#allocation5 + $0x48] sm:$0xff]  ;;  %v213_v17 = vld [vmem:[#allocation5 + $0x50] sm:$0xff]  ;;  %s372_s10 = scalar_lea.sflag [#allocation4], %s982_s30  ;;  %s754_s11 = scalar_lea.vmem %s1010_s26, 128 }
  0x59   : > { %587 = vmatprep.subr.bf16.mxu0 %v830_v0  ;;  %611 = vmatprep.subr.bf16.mxu1 %v830_v0  ;;  %v597_v16 = vpack.c.bf16 %v212_v15, %v211_v14  ;;  %v214_v18 = vld [vmem:[#allocation5 + $0x58] sm:$0xff]  ;;  %v215_v20 = vld [vmem:[#allocation5 + $0x60] sm:$0xff]  ;;  %v216_v21 = vld [vmem:[#allocation5 + $0x68] sm:$0xff]  ;;  %p755_p1 = scmp.ne.s32.totalorder %s1010_s26, %s754_s11  ;;  %s833_s16 = smov [#allocation7]  }
  0x5a   : > { %v600_v19 = vpack.c.bf16 %v214_v18, %v213_v17  ;;  %v603_v22 = vpack.c.bf16 %v216_v21, %v215_v20  ;;  %v217_v23 = vld [vmem:[#allocation5 + $0x70] sm:$0xff]  ;;  %v218_v24 = vld [vmem:[#allocation5 + $0x78] sm:$0xff]  ;;  %s758_s27 = sshll.u32 %s833_s16, 4  ;;  %s759_s27 = int_to_ptr.vmem [resolvable:$false] %s758_s27 }
  0x5b   : > { %v606_v25 = vpack.c.bf16 %v218_v24, %v217_v23  ;;  %v201_v26 = vld [vmem:[%s988_s7] sm:$0xff]  ;;  %p756_p4 = pnand %p755_p1, %p937_p12  ;;  %s760_s28 = scalar_lea.vmem %s759_s27, 256 }
  0x5c   : > { %589 = vmatpush3.bf16.msra.mxu0 %v588_v7  ;;  %613 = vmatpush3.bf16.msra.mxu1 %v588_v7  ;;  %v475_v35 = vld [vmem:[%s1052_s1] ss:$0 sm:$0xff]  ;;  %p761_p8 = scmp.lt.s32.totalorder %s1010_s26, %s759_s27  ;;  %p762_p13 = scmp.lt.s32.totalorder %s760_s28, %s754_s11 }
  0x5d   : > { %590 = vmatprep.subr.bf16.mxu0 %v830_v0  ;;  %614 = vmatprep.subr.bf16.mxu1 %v830_v0  ;;  %p757_p6 = pneg %p756_p4 }
  0x5e   : > { %p763_p3 = por %p762_p13, %p761_p8 }
  0x60   : > { %592 = vmatpush3.bf16.msra.mxu0 %v591_v10  ;;  %616 = vmatpush3.bf16.msra.mxu1 %v591_v10  ;;  %p764_p7 = pnand %p763_p3, %p757_p6 }
  0x61   : > { %593 = vmatprep.subr.bf16.mxu0 %v830_v0  ;;  %617 = vmatprep.subr.bf16.mxu1 %v830_v0 }
  0x64   : > { %595 = vmatpush3.bf16.msra.mxu0 %v594_v13  ;;  %619 = vmatpush3.bf16.msra.mxu1 %v594_v13 }
  0x65   : > { %596 = vmatprep.subr.bf16.mxu0 %v830_v0  ;;  %620 = vmatprep.subr.bf16.mxu1 %v830_v0 }
  0x68   : > { %598 = vmatpush3.bf16.msra.mxu0 %v597_v16  ;;  %622 = vmatpush3.bf16.msra.mxu1 %v597_v16 }
  0x69   : > { %599 = vmatprep.subr.bf16.mxu0 %v830_v0  ;;  %623 = vmatprep.subr.bf16.mxu1 %v830_v0 }
  0x6c   : > { %601 = vmatpush3.bf16.msra.mxu0 %v600_v19  ;;  %625 = vmatpush3.bf16.msra.mxu1 %v600_v19 }
  0x6d   : > { %602 = vmatprep.subr.bf16.mxu0 %v830_v0  ;;  %626 = vmatprep.subr.bf16.mxu1 %v830_v0 }
  0x70   : > { %604 = vmatpush3.bf16.msra.mxu0 %v603_v22  ;;  %628 = vmatpush3.bf16.msra.mxu1 %v603_v22 }
  0x71   : > { %605 = vmatprep.subr.bf16.mxu0 %v830_v0  ;;  %629 = vmatprep.subr.bf16.mxu1 %v830_v0 }
  0x74   : > { %607 = vmatpush3.bf16.msra.mxu0 %v606_v25  ;;  %631 = vmatpush3.bf16.msra.mxu1 %v606_v25 }
  0x77   : > { %547 = vmatmul.mubr.f32.vlgmr.msra.gmra.mrb[0].mxu0 %v201_v26 }
 0x14a   : > { %v285_v27 = vpop.f32.mrb[0].mxu0 }
 0x14b   : > { %v289_v28 = vsub.f32 %v201_v26, %v285_v27  ;;  %v548_v29 = vpop.f32.mrb[1].mxu0 }
 0x14d   : > { %v290_v30 = vmul.f32 %v289_v28, %v289_v28 }
 0x14f   : > { %582 = vmatmul.mubr.f32.vlgmr.msra.gmra.mrb[0].mxu1 %v290_v30 }
 0x222   : > { %v357_v31 = vpop.f32.mrb[0].mxu1 }
 0x223   : > { %v358_v32 = vadd.f32 1e-05, %v357_v31  ;;  %v583_v33 = vpop.f32.mrb[1].mxu1 }
 0x225   : > { %694 = vrsqrt.f32 %v358_v32 }
 0x22f   : > { %v695_v34 = vpop.eup %694 }
 0x230   : > { %v362_v36 = vmul.f32 %v695_v34, %v201_v26 }
 0x232   : > { %v369_v37 = vmul.f32 %v475_v35, %v362_v36 }
 0x234   : > { %370 = vst [vmem:[%s200_s25] sm:$0xff] %v369_v37 }
 0x235   : > { %767 = shalt.err (!%p764_p7)
}
 0x236   : > { %s768_s29 = scalar_lea.hbm %s1008_s9, 128  ;;  %s772_s22 = scalar_lea.hbm %s1054_s3, 512 }
 0x237   : > { %p769_p9 = scmp.ne.s32.totalorder %s1008_s9, %s768_s29  ;;  %p773_p0 = scmp.lt.u32.totalorder %s1008_s9, %s1054_s3 }
 0x238   : > { %p774_p10 = scmp.lt.u32.totalorder %s772_s22, %s768_s29  ;;  %p776_p1 = scmp.lt.u32.totalorder %s768_s29, %s1008_s9 }
 0x239   : > { %p770_p11 = pnand %p769_p9, %p937_p12 }
 0x23a   : > { %p775_p2 = por %p774_p10, %p773_p0 }
 0x23b   : > { %p771_p5 = pneg %p770_p11 }
 0x23c   : > { %p777_p4 = por %p776_p1, %p775_p2 }
 0x23e   : > { %p778_p6 = pnand %p777_p4, %p771_p5 }
 0x240   : > { %781 = shalt.err (!%p778_p6)
}
 0x241   : > { %638 = dma.vmem_to_hbm [thread:$0]  (%p937_p12), %s1010_s26, 128, %s1008_s9, %s372_s10  }
 0x242 PF: > { %p655_p8 = scmp.ge.s32.totalorder %s824_s15, 2  ;;  %s397_s18 = sand.u32 1, %s812_s12  }
 0x243   : > { %p1069_p13 = scmp.ne.s32.totalorder %s1059_s19, 0  ;;  %s398_s20 = scalar_lea.sflag [#allocation4], %s397_s18 }
 0x245   : > { %p649_p3 = pnand %p655_p8, %p1069_p13 }
 0x247   : > { %807 = dma.done.wait (!%p649_p3), %s398_s20, 128  }
 0x248   : > { %809 = vsyncadd (!%p649_p3), %s398_s20, 4294967168  ;;  %p17_p7 = scmp.ge.s32.totalorder %s907_s24, 6   ;;  %s1070_s12 = smov %s816_s13 }
 0x249   : > { %s1071_s13 = smov %s820_s14  ;;  %s1072_s14 = smov %s933_s17 }
 0x24a   : > { %s1073_s15 = smov %s907_s24  ;;  %19 = sbr.rel (!%p17_p7) target bundleno = 6 (0x6), region = 81 }
 0x251   :  { %403 = vsyncpa [#allocation3], 1 }
 0x252   :  { %405 = vsyncpa [#allocation3 + $0x1], 1 }
 0x253   :  { %406 = vsyncpa [#allocation6], 1 }
 0x254   :  { %407 = vsyncpa [#allocation4], 1 }
 0x255   :  { %409 = vsyncpa [#allocation4 + $0x1], 1 }

</bundles_post_ra>
